<compile_context>
chip_gen: v6e
topology: v6e:2x2x1
jax: 0.10.0
libtpu: 0.0.40
codegen_flags: <defaults>
</compile_context>

<pallas_src>
import functools

import jax
import jax.numpy as jnp
from jax.experimental import pallas as pl
from jax.experimental.pallas import tpu as pltpu


def _round_up(x: int, n: int) -> int:
    return ((x + n - 1) // n) * n


def _ffn_kernel(*refs, num_hidden_layers: int, sigmoid_output: bool):
    if num_hidden_layers > 0:
        (x_ref, w_in_ref, b_in_ref, w_hid_ref, b_hid_ref,
         w_out_ref, b_out_ref, o_ref) = refs
    else:
        x_ref, w_in_ref, b_in_ref, w_out_ref, b_out_ref, o_ref = refs
        w_hid_ref = b_hid_ref = None

    mxu_dtype = w_in_ref.dtype  # bf16 MXU operands, f32 accumulation

    # In-kernel cast of the activation (VPU, free next to the MXU) — avoids a
    # wrapper-side HBM read/write pass over x.
    x = x_ref[...].astype(mxu_dtype)

    # proj_in + ReLU.  Bias+ReLU+downcast fused so only the bf16 copy of the
    # intermediate stays live in vregs.
    h = jnp.dot(x, w_in_ref[...], preferred_element_type=jnp.float32)
    h = jnp.maximum(h + b_in_ref[...], 0.0).astype(mxu_dtype)

    # (num_layers - 2) hidden Linear layers, each followed by ReLU.
    for l in range(num_hidden_layers):
        h = jnp.dot(h, w_hid_ref[l], preferred_element_type=jnp.float32)
        h = jnp.maximum(h + b_hid_ref[l], 0.0).astype(mxu_dtype)

    # proj_out (+ optional sigmoid, EUP slot — effectively free next to MXU).
    out = jnp.dot(h, w_out_ref[...], preferred_element_type=jnp.float32)
    out = out + b_out_ref[...]
    if sigmoid_output:
        out = jax.nn.sigmoid(out)

    o_ref[...] = out.astype(o_ref.dtype)


def prepare_params(params, *, mxu_dtype=jnp.bfloat16):
    """One-time parameter prep (hoisted out of the per-call path):
    bf16 casts of the weights, f32 biases, and lane-dense padding of the
    output projection to a multiple of 128."""
    w_in = params["w_in"].astype(mxu_dtype)
    b_in = params["b_in"].astype(jnp.float32)
    w_hid = params["w_hid"].astype(mxu_dtype)
    b_hid = params["b_hid"].astype(jnp.float32)
    w_out = params["w_out"]
    b_out = params["b_out"]

    output_dim = int(w_out.shape[1])
    o_pad = _round_up(output_dim, 128)
    if o_pad != output_dim:
        w_out = jnp.pad(w_out, ((0, 0), (0, o_pad - output_dim)))
        b_out = jnp.pad(b_out, ((0, 0), (0, o_pad - output_dim)))
    w_out = w_out.astype(mxu_dtype)
    b_out = b_out.astype(jnp.float32)

    return {"w_in": w_in, "b_in": b_in, "w_hid": w_hid, "b_hid": b_hid,
            "w_out": w_out, "b_out": b_out, "output_dim": output_dim}


def _choose_tm(m: int, tm_max: int) -> int:
    """Row tile: multiple of 16, balanced over the number of tiles needed so
    row-padding waste is small, and >= 2 grid steps when there is enough work
    (lets the 'parallel' axis use both v7x TensorCores)."""
    tm_max = max(16, (tm_max // 16) * 16)   # clamp to a multiple of 16
    n_tiles = max(-(-m // tm_max), 1)
    if m >= 32:
        n_tiles = max(n_tiles, 2)
    tm = min(_round_up(-(-m // n_tiles), 16), tm_max)
    return tm


def sam_feed_forward(hidden_states, params, *, sigmoid_output=False,
                     tm_max=128):
    """Pallas implementation of SamFeedForward.forward.

    hidden_states: (..., input_dim) float array.
    params: output of prepare_params() (a raw param dict is also accepted and
            will be prepared on the fly).
    """
    if "output_dim" not in params:
        params = prepare_params(params)

    w_in, b_in = params["w_in"], params["b_in"]
    w_hid, b_hid = params["w_hid"], params["b_hid"]
    w_out, b_out = params["w_out"], params["b_out"]
    output_dim = int(params["output_dim"])

    input_dim, hidden_dim = int(w_in.shape[0]), int(w_in.shape[1])
    num_hidden_layers = int(w_hid.shape[0])
    o_pad = int(w_out.shape[1])
    out_dtype = hidden_states.dtype

    lead_shape = hidden_states.shape[:-1]
    x2d = hidden_states.reshape(-1, input_dim)
    m = int(x2d.shape[0])

    tm = _choose_tm(m, tm_max)
    grid = (pl.cdiv(m, tm),)   # ragged last row-block is masked by Pallas.

    # VMEM budget: x/out double buffers + weights (assume worst-case double
    # buffering for the limit) + headroom; capped at 32 MiB (<= half of v7x's
    # 64 MiB per TensorCore).
    weight_bytes = sum(int(a.size) * a.dtype.itemsize
                       for a in (w_in, b_in, w_hid, b_hid, w_out, b_out))
    io_bytes = 2 * (tm * input_dim * hidden_states.dtype.itemsize
                    + tm * o_pad * out_dtype.itemsize)
    working = io_bytes + 2 * weight_bytes
    vmem_limit = int(min(max(2 * working + (4 << 20), 16 << 20), 32 << 20))

    kernel = functools.partial(
        _ffn_kernel,
        num_hidden_layers=num_hidden_layers,
        sigmoid_output=sigmoid_output,
    )

    def _weight_spec(shape, single_buffer):
        ndim = len(shape)
        idx = lambda i: (0,) * ndim   # grid-invariant
        if single_buffer:
            return pl.BlockSpec(shape, idx, pipeline_mode=pl.Buffered(1))
        return pl.BlockSpec(shape, idx)

    def _run(single_buffer_weights):
        in_specs = [
            pl.BlockSpec((tm, input_dim), lambda i: (i, 0)),
            _weight_spec((input_dim, hidden_dim), single_buffer_weights),
            _weight_spec((1, hidden_dim), single_buffer_weights),
        ]
        args = [x2d, w_in, b_in]
        if num_hidden_layers > 0:
            in_specs += [
                _weight_spec((num_hidden_layers, hidden_dim, hidden_dim),
                             single_buffer_weights),
                _weight_spec((num_hidden_layers, 1, hidden_dim),
                             single_buffer_weights),
            ]
            args += [w_hid, b_hid]
        # (num_layers == 2: no dummy hidden block is allocated or DMA'd.)
        in_specs += [
            _weight_spec((hidden_dim, o_pad), single_buffer_weights),
            _weight_spec((1, o_pad), single_buffer_weights),
        ]
        args += [w_out, b_out]

        return pl.pallas_call(
            kernel,
            out_shape=jax.ShapeDtypeStruct((m, o_pad), out_dtype),
            grid_spec=pltpu.PrefetchScalarGridSpec(
                num_scalar_prefetch=0,
                grid=grid,
                in_specs=in_specs,
                out_specs=pl.BlockSpec((tm, o_pad), lambda i: (i, 0)),
            ),
            compiler_params=pltpu.CompilerParams(
                dimension_semantics=("parallel",),
                vmem_limit_bytes=vmem_limit,
            ),
        )(*args)

    try:
        out2d = _run(True)            # single-buffered (grid-invariant) weights
    except Exception:
        out2d = _run(False)           # fallback if Buffered(1) is unsupported

    if o_pad != output_dim:
        out2d = out2d[:, :output_dim]
    return out2d.reshape(*lead_shape, output_dim)


def init_params(key, input_dim, hidden_dim, output_dim, num_layers,
                dtype=jnp.float32):
    """Deterministic synthetic parameter init (nn.Linear shapes, stored
    transposed as (in, out))."""
    num_hidden_layers = num_layers - 2
    ks = jax.random.split(key, 6)
    scale_in = 1.0 / (input_dim ** 0.5)
    scale_h = 1.0 / (hidden_dim ** 0.5)
    return {
        "w_in": jax.random.uniform(ks[0], (input_dim, hidden_dim), dtype,
                                   -scale_in, scale_in),
        "b_in": jax.random.uniform(ks[1], (1, hidden_dim), dtype,
                                   -scale_in, scale_in),
        "w_hid": jax.random.uniform(ks[2],
                                    (num_hidden_layers, hidden_dim, hidden_dim),
                                    dtype, -scale_h, scale_h),
        "b_hid": jax.random.uniform(ks[3],
                                    (num_hidden_layers, 1, hidden_dim),
                                    dtype, -scale_h, scale_h),
        "w_out": jax.random.uniform(ks[4], (hidden_dim, output_dim), dtype,
                                    -scale_h, scale_h),
        "b_out": jax.random.uniform(ks[5], (1, output_dim), dtype,
                                    -scale_h, scale_h),
    }


def _reference(hidden_states, params, sigmoid_output=False):
    """Pure-JAX f32 reference for correctness check."""
    h = jnp.maximum(hidden_states @ params["w_in"] + params["b_in"][0], 0.0)
    for l in range(params["w_hid"].shape[0]):
        h = jnp.maximum(h @ params["w_hid"][l] + params["b_hid"][l, 0], 0.0)
    out = h @ params["w_out"] + params["b_out"][0]
    if sigmoid_output:
        out = jax.nn.sigmoid(out)
    return out


if __name__ == "__main__":
    key = jax.random.PRNGKey(0)
    k_x, k_p = jax.random.split(key)

    batch, seq = 2, 8
    input_dim, hidden_dim, output_dim = 32, 32, 16
    num_layers = 3          # proj_in + 1 hidden layer + proj_out
    sigmoid_output = False  # module default

    x = jax.random.normal(k_x, (batch, seq, input_dim), dtype=jnp.float32)
    params = init_params(k_p, input_dim, hidden_dim, output_dim, num_layers)

    prepared = prepare_params(params)   # one-time weight prep (pad + bf16 cast)
    out = sam_feed_forward(x, prepared, sigmoid_output=sigmoid_output)
    out = jax.block_until_ready(out)

    ref = _reference(x, params, sigmoid_output)
    assert out.shape == (batch, seq, output_dim)
    # bf16 MXU operands (f32 accumulation) -> loosened tolerance vs f32 ref.
    assert jnp.allclose(out, ref, atol=5e-2, rtol=5e-2), "mismatch vs reference"

    print("KERNEL_OK")
</pallas_src>

<mosaic_0001>
module attributes {stable_mosaic.version = 11 : i64} {
  func.func @_ffn_kernel(%arg0: i32, %arg1: memref<16x32xf32, #tpu.memory_space<vmem>>, %arg2: memref<32x32xbf16, #tpu.memory_space<vmem>>, %arg3: memref<1x32xf32, #tpu.memory_space<vmem>>, %arg4: memref<1x32x32xbf16, #tpu.memory_space<vmem>>, %arg5: memref<1x1x32xf32, #tpu.memory_space<vmem>>, %arg6: memref<32x128xbf16, #tpu.memory_space<vmem>>, %arg7: memref<1x128xf32, #tpu.memory_space<vmem>>, %arg8: memref<16x128xf32, #tpu.memory_space<vmem>>) attributes {dimension_semantics = [#tpu.dimension_semantics<parallel>], iteration_bounds = array<i64: 1>, scalar_prefetch = 0 : i64, scratch_operands = 0 : i64, tpu.core_type = #tpu.core_type<tc>, window_params = [{transform_indices = @transform_0, window_bounds = array<i64: 16, 32>}, {pipeline_mode = #tpu.pipeline_mode<synchronous>, transform_indices = @transform_1, window_bounds = array<i64: 32, 32>}, {pipeline_mode = #tpu.pipeline_mode<synchronous>, transform_indices = @transform_2, window_bounds = array<i64: 1, 32>}, {pipeline_mode = #tpu.pipeline_mode<synchronous>, transform_indices = @transform_3, window_bounds = array<i64: 1, 32, 32>}, {pipeline_mode = #tpu.pipeline_mode<synchronous>, transform_indices = @transform_4, window_bounds = array<i64: 1, 1, 32>}, {pipeline_mode = #tpu.pipeline_mode<synchronous>, transform_indices = @transform_5, window_bounds = array<i64: 32, 128>}, {pipeline_mode = #tpu.pipeline_mode<synchronous>, transform_indices = @transform_6, window_bounds = array<i64: 1, 128>}, {transform_indices = @transform_7, window_bounds = array<i64: 16, 128>}]} {
    %c0 = arith.constant 0 : index
    %c0_0 = arith.constant 0 : index
    %0 = vector.load %arg1[%c0, %c0_0] : memref<16x32xf32, #tpu.memory_space<vmem>>, vector<16x32xf32>
    %1 = arith.truncf %0 : vector<16x32xf32> to vector<16x32xbf16>
    %c0_1 = arith.constant 0 : index
    %c0_2 = arith.constant 0 : index
    %2 = vector.load %arg2[%c0_1, %c0_2] : memref<32x32xbf16, #tpu.memory_space<vmem>>, vector<32x32xbf16>
    %cst = arith.constant dense<0.000000e+00> : vector<16x32xf32>
    %3 = tpu.matmul %1, %2, %cst {dimension_numbers = #tpu.dot_dimension_numbers<[1], [0], [0], [1], [0, 0, 1, 1], [], []>} : vector<16x32xbf16>, vector<32x32xbf16>, vector<16x32xf32> -> vector<16x32xf32>
    %c0_3 = arith.constant 0 : index
    %c0_4 = arith.constant 0 : index
    %4 = vector.load %arg3[%c0_3, %c0_4] : memref<1x32xf32, #tpu.memory_space<vmem>>, vector<1x32xf32>
    %5 = vector.broadcast %4 : vector<1x32xf32> to vector<16x32xf32>
    %6 = arith.addf %3, %5 : vector<16x32xf32>
    %cst_5 = arith.constant 0.000000e+00 : f32
    %7 = vector.broadcast %cst_5 : f32 to vector<16x32xf32>
    %8 = arith.maximumf %6, %7 : vector<16x32xf32>
    %9 = arith.truncf %8 : vector<16x32xf32> to vector<16x32xbf16>
    %c0_6 = arith.constant 0 : index
    %c0_7 = arith.constant 0 : index
    %c0_8 = arith.constant 0 : index
    %10 = vector.load %arg4[%c0_6, %c0_7, %c0_8] : memref<1x32x32xbf16, #tpu.memory_space<vmem>>, vector<1x32x32xbf16>
    %11 = vector.shape_cast %10 : vector<1x32x32xbf16> to vector<32x32xbf16>
    %cst_9 = arith.constant dense<0.000000e+00> : vector<16x32xf32>
    %12 = tpu.matmul %9, %11, %cst_9 {dimension_numbers = #tpu.dot_dimension_numbers<[1], [0], [0], [1], [0, 0, 1, 1], [], []>} : vector<16x32xbf16>, vector<32x32xbf16>, vector<16x32xf32> -> vector<16x32xf32>
    %c0_10 = arith.constant 0 : index
    %c0_11 = arith.constant 0 : index
    %c0_12 = arith.constant 0 : index
    %13 = vector.load %arg5[%c0_10, %c0_11, %c0_12] : memref<1x1x32xf32, #tpu.memory_space<vmem>>, vector<1x1x32xf32>
    %14 = vector.shape_cast %13 : vector<1x1x32xf32> to vector<1x32xf32>
    %15 = vector.broadcast %14 : vector<1x32xf32> to vector<16x32xf32>
    %16 = arith.addf %12, %15 : vector<16x32xf32>
    %cst_13 = arith.constant 0.000000e+00 : f32
    %17 = vector.broadcast %cst_13 : f32 to vector<16x32xf32>
    %18 = arith.maximumf %16, %17 : vector<16x32xf32>
    %19 = arith.truncf %18 : vector<16x32xf32> to vector<16x32xbf16>
    %c0_14 = arith.constant 0 : index
    %c0_15 = arith.constant 0 : index
    %20 = vector.load %arg6[%c0_14, %c0_15] : memref<32x128xbf16, #tpu.memory_space<vmem>>, vector<32x128xbf16>
    %cst_16 = arith.constant dense<0.000000e+00> : vector<16x128xf32>
    %21 = tpu.matmul %19, %20, %cst_16 {dimension_numbers = #tpu.dot_dimension_numbers<[1], [0], [0], [1], [0, 0, 1, 1], [], []>} : vector<16x32xbf16>, vector<32x128xbf16>, vector<16x128xf32> -> vector<16x128xf32>
    %c0_17 = arith.constant 0 : index
    %c0_18 = arith.constant 0 : index
    %22 = vector.load %arg7[%c0_17, %c0_18] : memref<1x128xf32, #tpu.memory_space<vmem>>, vector<1x128xf32>
    %23 = vector.broadcast %22 : vector<1x128xf32> to vector<16x128xf32>
    %24 = arith.addf %21, %23 : vector<16x128xf32>
    %c0_19 = arith.constant 0 : index
    %c0_20 = arith.constant 0 : index
    %25 = vector.load %arg8[%c0_19, %c0_20] : memref<16x128xf32, #tpu.memory_space<vmem>>, vector<16x128xf32>
    tpu.vector_store %arg8[%c0_19, %c0_20], %24 {strides = array<i32>} : memref<16x128xf32, #tpu.memory_space<vmem>>, vector<16x128xf32>,
    return
  }
  func.func @transform_0(%arg0: i32) -> (i32, i32) {
    %c0_i32 = arith.constant 0 : i32
    %c0_i32_0 = arith.constant 0 : i32
    return %arg0, %c0_i32 : i32, i32
  }
  func.func @transform_1(%arg0: i32) -> (i32, i32) {
    %c0_i32 = arith.constant 0 : i32
    %c0_i32_0 = arith.constant 0 : i32
    %c0_i32_1 = arith.constant 0 : i32
    return %c0_i32, %c0_i32_0 : i32, i32
  }
  func.func @transform_2(%arg0: i32) -> (i32, i32) {
    %c0_i32 = arith.constant 0 : i32
    %c0_i32_0 = arith.constant 0 : i32
    %c0_i32_1 = arith.constant 0 : i32
    return %c0_i32, %c0_i32_0 : i32, i32
  }
  func.func @transform_3(%arg0: i32) -> (i32, i32, i32) {
    %c0_i32 = arith.constant 0 : i32
    %c0_i32_0 = arith.constant 0 : i32
    %c0_i32_1 = arith.constant 0 : i32
    %c0_i32_2 = arith.constant 0 : i32
    return %c0_i32, %c0_i32_0, %c0_i32_1 : i32, i32, i32
  }
  func.func @transform_4(%arg0: i32) -> (i32, i32, i32) {
    %c0_i32 = arith.constant 0 : i32
    %c0_i32_0 = arith.constant 0 : i32
    %c0_i32_1 = arith.constant 0 : i32
    %c0_i32_2 = arith.constant 0 : i32
    return %c0_i32, %c0_i32_0, %c0_i32_1 : i32, i32, i32
  }
  func.func @transform_5(%arg0: i32) -> (i32, i32) {
    %c0_i32 = arith.constant 0 : i32
    %c0_i32_0 = arith.constant 0 : i32
    %c0_i32_1 = arith.constant 0 : i32
    return %c0_i32, %c0_i32_0 : i32, i32
  }
  func.func @transform_6(%arg0: i32) -> (i32, i32) {
    %c0_i32 = arith.constant 0 : i32
    %c0_i32_0 = arith.constant 0 : i32
    %c0_i32_1 = arith.constant 0 : i32
    return %c0_i32, %c0_i32_0 : i32, i32
  }
  func.func @transform_7(%arg0: i32) -> (i32, i32) {
    %c0_i32 = arith.constant 0 : i32
    %c0_i32_0 = arith.constant 0 : i32
    return %arg0, %c0_i32 : i32, i32
  }
}

module attributes {stable_mosaic.version = 11 : i64} {
  func.func @_ffn_kernel(%arg0: i32, %arg1: memref<16x32xf32, #tpu.memory_space<vmem>>, %arg2: memref<32x32xbf16, #tpu.memory_space<vmem>>, %arg3: memref<1x32xf32, #tpu.memory_space<vmem>>, %arg4: memref<1x32x32xbf16, #tpu.memory_space<vmem>>, %arg5: memref<1x1x32xf32, #tpu.memory_space<vmem>>, %arg6: memref<32x128xbf16, #tpu.memory_space<vmem>>, %arg7: memref<1x128xf32, #tpu.memory_space<vmem>>, %arg8: memref<16x128xf32, #tpu.memory_space<vmem>>) attributes {dimension_semantics = [#tpu.dimension_semantics<parallel>], iteration_bounds = array<i64: 1>, scalar_prefetch = 0 : i64, scratch_operands = 0 : i64, tpu.core_type = #tpu.core_type<tc>, window_params = [{transform_indices = @transform_0, window_bounds = array<i64: 16, 32>}, {pipeline_mode = #tpu.pipeline_mode<synchronous>, transform_indices = @transform_1, window_bounds = array<i64: 32, 32>}, {pipeline_mode = #tpu.pipeline_mode<synchronous>, transform_indices = @transform_2, window_bounds = array<i64: 1, 32>}, {pipeline_mode = #tpu.pipeline_mode<synchronous>, transform_indices = @transform_3, window_bounds = array<i64: 1, 32, 32>}, {pipeline_mode = #tpu.pipeline_mode<synchronous>, transform_indices = @transform_4, window_bounds = array<i64: 1, 1, 32>}, {pipeline_mode = #tpu.pipeline_mode<synchronous>, transform_indices = @transform_5, window_bounds = array<i64: 32, 128>}, {pipeline_mode = #tpu.pipeline_mode<synchronous>, transform_indices = @transform_6, window_bounds = array<i64: 1, 128>}, {transform_indices = @transform_7, window_bounds = array<i64: 16, 128>}]} {
    %c0 = arith.constant 0 : index
    %c0_0 = arith.constant 0 : index
    %0 = vector.load %arg1[%c0, %c0_0] : memref<16x32xf32, #tpu.memory_space<vmem>>, vector<16x32xf32>
    %1 = arith.truncf %0 : vector<16x32xf32> to vector<16x32xbf16>
    %c0_1 = arith.constant 0 : index
    %c0_2 = arith.constant 0 : index
    %2 = vector.load %arg2[%c0_1, %c0_2] : memref<32x32xbf16, #tpu.memory_space<vmem>>, vector<32x32xbf16>
    %cst = arith.constant dense<0.000000e+00> : vector<16x32xf32>
    %3 = tpu.matmul %1, %2, %cst {dimension_numbers = #tpu.dot_dimension_numbers<[1], [0], [0], [1], [0, 0, 1, 1], [], []>} : vector<16x32xbf16>, vector<32x32xbf16>, vector<16x32xf32> -> vector<16x32xf32>
    %c0_3 = arith.constant 0 : index
    %c0_4 = arith.constant 0 : index
    %4 = vector.load %arg3[%c0_3, %c0_4] : memref<1x32xf32, #tpu.memory_space<vmem>>, vector<1x32xf32>
    %5 = vector.broadcast %4 : vector<1x32xf32> to vector<16x32xf32>
    %6 = arith.addf %3, %5 : vector<16x32xf32>
    %cst_5 = arith.constant 0.000000e+00 : f32
    %7 = vector.broadcast %cst_5 : f32 to vector<16x32xf32>
    %8 = arith.maximumf %6, %7 : vector<16x32xf32>
    %9 = arith.truncf %8 : vector<16x32xf32> to vector<16x32xbf16>
    %c0_6 = arith.constant 0 : index
    %c0_7 = arith.constant 0 : index
    %c0_8 = arith.constant 0 : index
    %10 = vector.load %arg4[%c0_6, %c0_7, %c0_8] : memref<1x32x32xbf16, #tpu.memory_space<vmem>>, vector<1x32x32xbf16>
    %11 = vector.shape_cast %10 : vector<1x32x32xbf16> to vector<32x32xbf16>
    %cst_9 = arith.constant dense<0.000000e+00> : vector<16x32xf32>
    %12 = tpu.matmul %9, %11, %cst_9 {dimension_numbers = #tpu.dot_dimension_numbers<[1], [0], [0], [1], [0, 0, 1, 1], [], []>} : vector<16x32xbf16>, vector<32x32xbf16>, vector<16x32xf32> -> vector<16x32xf32>
    %c0_10 = arith.constant 0 : index
    %c0_11 = arith.constant 0 : index
    %c0_12 = arith.constant 0 : index
    %13 = vector.load %arg5[%c0_10, %c0_11, %c0_12] : memref<1x1x32xf32, #tpu.memory_space<vmem>>, vector<1x1x32xf32>
    %14 = vector.shape_cast %13 : vector<1x1x32xf32> to vector<1x32xf32>
    %15 = vector.broadcast %14 : vector<1x32xf32> to vector<16x32xf32>
    %16 = arith.addf %12, %15 : vector<16x32xf32>
    %cst_13 = arith.constant 0.000000e+00 : f32
    %17 = vector.broadcast %cst_13 : f32 to vector<16x32xf32>
    %18 = arith.maximumf %16, %17 : vector<16x32xf32>
    %19 = arith.truncf %18 : vector<16x32xf32> to vector<16x32xbf16>
    %c0_14 = arith.constant 0 : index
    %c0_15 = arith.constant 0 : index
    %20 = vector.load %arg6[%c0_14, %c0_15] : memref<32x128xbf16, #tpu.memory_space<vmem>>, vector<32x128xbf16>
    %cst_16 = arith.constant dense<0.000000e+00> : vector<16x128xf32>
    %21 = tpu.matmul %19, %20, %cst_16 {dimension_numbers = #tpu.dot_dimension_numbers<[1], [0], [0], [1], [0, 0, 1, 1], [], []>} : vector<16x32xbf16>, vector<32x128xbf16>, vector<16x128xf32> -> vector<16x128xf32>
    %c0_17 = arith.constant 0 : index
    %c0_18 = arith.constant 0 : index
    %22 = vector.load %arg7[%c0_17, %c0_18] : memref<1x128xf32, #tpu.memory_space<vmem>>, vector<1x128xf32>
    %23 = vector.broadcast %22 : vector<1x128xf32> to vector<16x128xf32>
    %24 = arith.addf %21, %23 : vector<16x128xf32>
    %c0_19 = arith.constant 0 : index
    %c0_20 = arith.constant 0 : index
    %25 = vector.load %arg8[%c0_19, %c0_20] : memref<16x128xf32, #tpu.memory_space<vmem>>, vector<16x128xf32>
    tpu.vector_store %arg8[%c0_19, %c0_20], %24 {strides = array<i32>} : memref<16x128xf32, #tpu.memory_space<vmem>>, vector<16x128xf32>,
    return
  }
  func.func @transform_0(%arg0: i32) -> (i32, i32) {
    %c0_i32 = arith.constant 0 : i32
    %c0_i32_0 = arith.constant 0 : i32
    return %arg0, %c0_i32 : i32, i32
  }
  func.func @transform_1(%arg0: i32) -> (i32, i32) {
    %c0_i32 = arith.constant 0 : i32
    %c0_i32_0 = arith.constant 0 : i32
    %c0_i32_1 = arith.constant 0 : i32
    return %c0_i32, %c0_i32_0 : i32, i32
  }
  func.func @transform_2(%arg0: i32) -> (i32, i32) {
    %c0_i32 = arith.constant 0 : i32
    %c0_i32_0 = arith.constant 0 : i32
    %c0_i32_1 = arith.constant 0 : i32
    return %c0_i32, %c0_i32_0 : i32, i32
  }
  func.func @transform_3(%arg0: i32) -> (i32, i32, i32) {
    %c0_i32 = arith.constant 0 : i32
    %c0_i32_0 = arith.constant 0 : i32
    %c0_i32_1 = arith.constant 0 : i32
    %c0_i32_2 = arith.constant 0 : i32
    return %c0_i32, %c0_i32_0, %c0_i32_1 : i32, i32, i32
  }
  func.func @transform_4(%arg0: i32) -> (i32, i32, i32) {
    %c0_i32 = arith.constant 0 : i32
    %c0_i32_0 = arith.constant 0 : i32
    %c0_i32_1 = arith.constant 0 : i32
    %c0_i32_2 = arith.constant 0 : i32
    return %c0_i32, %c0_i32_0, %c0_i32_1 : i32, i32, i32
  }
  func.func @transform_5(%arg0: i32) -> (i32, i32) {
    %c0_i32 = arith.constant 0 : i32
    %c0_i32_0 = arith.constant 0 : i32
    %c0_i32_1 = arith.constant 0 : i32
    return %c0_i32, %c0_i32_0 : i32, i32
  }
  func.func @transform_6(%arg0: i32) -> (i32, i32) {
    %c0_i32 = arith.constant 0 : i32
    %c0_i32_0 = arith.constant 0 : i32
    %c0_i32_1 = arith.constant 0 : i32
    return %c0_i32, %c0_i32_0 : i32, i32
  }
  func.func @transform_7(%arg0: i32) -> (i32, i32) {
    %c0_i32 = arith.constant 0 : i32
    %c0_i32_0 = arith.constant 0 : i32
    return %arg0, %c0_i32 : i32, i32
  }
}

</mosaic_0001>

<bundles_post_ra>
// kernel: tpu_custom_call.1
= control target key start
LH: loop header
LB: loop body
LE: loop exit
PB: predicated region body
PF: predicated region fallthrough
CT: control target
= control target key end

     0   :  { %12 = vsyncpa [#allocation3], 0  ;;  %s578_s0 = inlined_call_operand.hbm [shape: f32[16,32], index: 0, kind: input, shape index: {}]   ;;  %s579_s1 = inlined_call_operand.hbm [shape: bf16[32,32], index: 1, kind: input, shape index: {}]   ;;  %s580_s2 = inlined_call_operand.vmem [shape: f32[1,32], index: 2, kind: input, shape index: {}]   ;;  %s581_s3 = inlined_call_operand.hbm [shape: bf16[1,32,32], index: 3, kind: input, shape index: {}]   ;;  %s582_s4 = inlined_call_operand.vmem [shape: f32[1,1,32], index: 4, kind: input, shape index: {}]   ;;  %s583_s5 = inlined_call_operand.hbm [shape: bf16[32,128], index: 5, kind: input, shape index: {}]   ;;  %s584_s6 = inlined_call_operand.vmem [shape: f32[1,128], index: 6, kind: input, shape index: {}]   ;;  %s585_s7 = inlined_call_operand.hbm [shape: f32[16,128], index: 7, kind: output, shape index: {}]  }
   0x1   :  { %13 = vsyncpa [#allocation6], 0 }
   0x2   :  { %14 = vsyncpa [#allocation9], 0 }
   0x3   :  { %15 = vsyncpa [#allocation4], 0  ;;  %s485_s24 = smov [#allocation5]  }
   0x4   :  { %s33_s25 = sshll.u32 %s485_s24, 4  ;;  %s34_s25 = int_to_ptr.vmem [resolvable:$true] %s33_s25 }
   0x5   :  { %s385_s26 = scalar_lea.vmem %s34_s25, 256  ;;  %p390_p1 = scmp.lt.s32.totalorder %s34_s25, %s34_s25 }
   0x6   :  { %p386_p0 = scmp.ne.s32.totalorder %s34_s25, %s385_s26  ;;  %p391_p2 = scmp.lt.s32.totalorder %s385_s26, %s385_s26 }
   0x8   :  { %p392_p3 = por %p391_p2, %p390_p1 }
   0xa   :  { %p393_p4 = pnand %p392_p3, %p386_p0 }
   0xc   :  { %396 = shalt.err (!%p393_p4)
}
   0xd   :  { %s486_s27 = smov 64   ;;  %s487_s28 = smov 4  }
   0xe   :  { %39 = dma.hbm_to_vmem [thread:$0]  %s579_s1, 256, %s34_s25, [#allocation6], %s486_s27, %s486_s27, %s487_s28  }
   0xf   :  { %s488_s8 = smov [#allocation2]  }
  0x10   :  { %s21_s9 = sshll.u32 %s488_s8, 4  ;;  %s22_s9 = int_to_ptr.vmem [resolvable:$true] %s21_s9 }
  0x11   :  { %s405_s10 = scalar_lea.vmem %s22_s9, 256  ;;  %p410_p6 = scmp.lt.s32.totalorder %s22_s9, %s22_s9 }
  0x12   :  { %p406_p5 = scmp.ne.s32.totalorder %s22_s9, %s405_s10  ;;  %p411_p7 = scmp.lt.s32.totalorder %s405_s10, %s405_s10 }
  0x14   :  { %p412_p8 = por %p411_p7, %p410_p6 }
  0x16   :  { %p413_p9 = pnand %p412_p8, %p406_p5 }
  0x18   :  { %416 = shalt.err (!%p413_p9)
}
  0x19   :  { %s489_s11 = smov 128   ;;  %s490_s12 = smov 8  }
  0x1a   :  { %27 = dma.hbm_to_vmem [thread:$0]  %s578_s0, 256, %s22_s9, [#allocation3], %s489_s11, %s489_s11, %s490_s12  }
  0x1b   :  { %s491_s1 = smov [#allocation7]   ;;  %s492_s16 = smov [#allocation8]  }
  0x1c   :  { %s47_s15 = sshll.u32 %s491_s1, 4  ;;  %s61_s17 = sshll.u32 %s492_s16, 4  ;;  %s48_s15 = int_to_ptr.vmem [resolvable:$true] %s47_s15  ;;  %s62_s17 = int_to_ptr.vmem [resolvable:$true] %s61_s17 }
  0x1d   :  { %s425_s18 = scalar_lea.vmem %s48_s15, 256  ;;  %p430_p11 = scmp.lt.s32.totalorder %s48_s15, %s48_s15 }
  0x1e   :  { %p426_p10 = scmp.ne.s32.totalorder %s48_s15, %s425_s18  ;;  %p431_p12 = scmp.lt.s32.totalorder %s425_s18, %s425_s18 }
  0x20   :  { %p432_p13 = por %p431_p12, %p430_p11 }
  0x22   :  { %p433_p0 = pnand %p432_p13, %p426_p10 }
  0x24   :  { %436 = shalt.err (!%p433_p0)
}
  0x25   :  { %53 = dma.hbm_to_vmem [thread:$0]  %s581_s3, 256, %s48_s15, [#allocation6], %s486_s27, %s486_s27, %s487_s28  }
  0x26   :  { %s445_s0 = scalar_lea.vmem %s62_s17, 256  ;;  %p450_p2 = scmp.lt.s32.totalorder %s62_s17, %s62_s17 }
  0x27   :  { %p446_p1 = scmp.ne.s32.totalorder %s62_s17, %s445_s0  ;;  %p451_p3 = scmp.lt.s32.totalorder %s445_s0, %s445_s0 }
  0x29   :  { %p452_p4 = por %p451_p3, %p450_p2 }
  0x2b   :  { %p453_p5 = pnand %p452_p4, %p446_p1 }
  0x2d   :  { %456 = shalt.err (!%p453_p5)
}
  0x2e   :  { %67 = dma.hbm_to_vmem [thread:$0]  %s583_s5, 256, %s62_s17, [#allocation9], %s486_s27, %s486_s27, %s487_s28  }
  0x2f   :  { %477 = dma.done.wait [#allocation3], 256  }
  0x30   :  { %478 = vsyncadd [#allocation3], 4294967040 }
  0x31   :  { %479 = dma.done.wait [#allocation6], 512  }
  0x32   :  { %480 = vsyncadd [#allocation6], 4294966784 }
  0x33   :  { %481 = dma.done.wait [#allocation9], 256  }
  0x34   :  { %482 = vsyncadd [#allocation9], 4294967040  ;;  %v493_v0 = vmov 0.0   ;;  %vm494_vm0 = vmmov 0   ;;  %v371_v1 = vld [vmem:[#allocation5 + $0x8] sm:$0xff]   ;;  %v372_v2 = vld [vmem:[#allocation5] sm:$0xff]  }
  0x35   :  { %336 = vmatprep.subr.bf16.mxu0 %v493_v0  ;;  %340 = vmatprep.mubr.msk.bf16.mxu0 %vm494_vm0, %v493_v0  ;;  %v83_v3 = vld [vmem:[#allocation2] sm:$0xff]  ;;  %v84_v4 = vld [vmem:[#allocation2 + $0x8] sm:$0xff]  ;;  %vm109_vm1 = vcmask 261120   ;;  %v375_v18 = vld [vmem:[#allocation8 + $0x8] sm:$0xff]   ;;  %s495_s26 = smov [#allocation10]  }
  0x36   :  { %344 = vmatprep.subr.bf16.mxu1 %v493_v0  ;;  %348 = vmatprep.mubr.msk.bf16.mxu1 %vm494_vm0, %v493_v0  ;;  %v85_v5 = vpack.c.bf16 %v84_v4, %v83_v3  ;;  %v373_v6 = vld [vmem:[#allocation7 + $0x8] sm:$0xff]   ;;  %v374_v7 = vld [vmem:[#allocation7] sm:$0xff]   ;;  %v376_v19 = vld [vmem:[#allocation8] sm:$0xff]  }
  0x37   :  { %337 = vmatpush3.bf16.msra.mxu0 %v371_v1  ;;  %345 = vmatpush3.bf16.msra.mxu1 %v373_v6  ;;  %v315_v8 = vld [vmem:[%s580_s2] ss:$0 sm:$0xff] }
  0x38   :  { %338 = vmatprep.subr.bf16.mxu0 %v493_v0  ;;  %346 = vmatprep.subr.bf16.mxu1 %v493_v0  ;;  %v319_v20 = vld [vmem:[%s582_s4] ss:$0 sm:$0xff]  ;;  %s301_s4 = sshll.u32 %s495_s26, 4  ;;  %s302_s4 = int_to_ptr.vmem [resolvable:$true] %s301_s4 }
  0x39   :  { %v323_v30 = vld [vmem:[%s584_s6] ss:$0 sm:$0xff]  ;;  %s457_s27 = scalar_lea.vmem %s302_s4, 256  ;;  %p462_p7 = scmp.lt.s32.totalorder %s302_s4, %s302_s4 }
  0x3a   :  { %p458_p6 = scmp.ne.s32.totalorder %s302_s4, %s457_s27  ;;  %p463_p8 = scmp.lt.s32.totalorder %s457_s27, %s457_s27 }
  0x3b   :  { %339 = vmatpush3.bf16.msra.mxu0 %v372_v2  ;;  %347 = vmatpush3.bf16.msra.mxu1 %v374_v7 }
  0x3c   :  { %352 = vmatprep.subr.bf16.mxu0 %v493_v0  ;;  %p464_p9 = por %p463_p8, %p462_p7 }
  0x3e   :  { %341 = vmatmul.mubr.msk.bf16.vlgmr.msra.gmra.mxu0 %vm109_vm1, %v85_v5  ;;  %p465_p10 = pnand %p464_p9, %p458_p6 }
  0x3f   :  { %356 = vmatprep.mubr.msk.bf16.mxu0 %vm494_vm0, %v493_v0  ;;  %353 = vmatpush3.bf16.msra.mxu0 %v375_v18 }
  0x40   :  { %354 = vmatprep.subr.bf16.mxu0 %v493_v0 }
  0x43   :  { %355 = vmatpush3.bf16.msra.mxu0 %v376_v19 }
  0xfe   :  { %v147_v9 = vpop.f32.mrf.mxu0 }
  0xff   :  { %v148_v11 = vadd.f32 %v315_v8, %v147_v9 }
 0x100   :  { %v342_v10 = vpop.f32.mrf.mxu0 }
 0x101   :  { %v154_v15 = vmax.f32 %v148_v11, 0.0 }
 0x102   :  { %v150_v12 = vpop.f32.mrf.mxu0 }
 0x103   :  { %v151_v13 = vadd.f32 %v315_v8, %v150_v12 }
 0x104   :  { %v343_v14 = vpop.f32.mrf.mxu0 }
 0x105   :  { %v155_v16 = vmax.f32 %v151_v13, 0.0 }
 0x107   :  { %v156_v17 = vpack.c.bf16 %v155_v16, %v154_v15 }
 0x109   :  { %349 = vmatmul.mubr.msk.bf16.vlgmr.msra.gmra.mxu1 %vm109_vm1, %v156_v17 }
 0x1c9   :  { %v217_v21 = vpop.f32.mrf.mxu1 }
 0x1ca   :  { %v218_v23 = vadd.f32 %v319_v20, %v217_v21 }
 0x1cb   :  { %v350_v22 = vpop.f32.mrf.mxu1 }
 0x1cc   :  { %v224_v27 = vmax.f32 %v218_v23, 0.0 }
 0x1cd   :  { %v220_v24 = vpop.f32.mrf.mxu1 }
 0x1ce   :  { %v221_v25 = vadd.f32 %v319_v20, %v220_v24 }
 0x1cf   :  { %v351_v26 = vpop.f32.mrf.mxu1 }
 0x1d0   :  { %v225_v28 = vmax.f32 %v221_v25, 0.0 }
 0x1d2   :  { %v226_v29 = vpack.c.bf16 %v225_v28, %v224_v27 }
 0x1d4   :  { %357 = vmatmul.mubr.msk.bf16.vlgmr.msra.gmra.mxu0 %vm109_vm1, %v226_v29 }
 0x294   :  { %v287_v31 = vpop.f32.mrf.mxu0 }
 0x295   :  { %v288_v32 = vadd.f32 %v323_v30, %v287_v31 }
 0x296   :  { %v358_v33 = vpop.f32.mrf.mxu0 }
 0x297   :  { %294 = vst [vmem:[#allocation10] sm:$0xff] %v288_v32 }
 0x298   :  { %v290_v34 = vpop.f32.mrf.mxu0 }
 0x299   :  { %v291_v35 = vadd.f32 %v323_v30, %v290_v34 }
 0x29a   :  { %v359_v36 = vpop.f32.mrf.mxu0 }
 0x29b   :  { %295 = vst [vmem:[#allocation10 + $0x8] sm:$0xff] %v291_v35 }
 0x29c   :  { %468 = shalt.err (!%p465_p10)
}
 0x29d   :  { %307 = dma.vmem_to_hbm [thread:$0]  %s302_s4, 256, %s585_s7, [#allocation4], %s489_s11, %s489_s11, %s490_s12  }
 0x29e   :  { %483 = dma.done.wait [#allocation4], 256  }
 0x29f   :  { %484 = vsyncadd [#allocation4], 4294967040 }
 0x2a0   :  { %311 = vsyncpa [#allocation3], 1 }
 0x2a1   :  { %312 = vsyncpa [#allocation6], 1 }
 0x2a2   :  { %313 = vsyncpa [#allocation9], 1 }
 0x2a3   :  { %314 = vsyncpa [#allocation4], 1 }

// kernel: tpu_custom_call.1
= control target key start
LH: loop header
LB: loop body
LE: loop exit
PB: predicated region body
PF: predicated region fallthrough
CT: control target
= control target key end

     0   :  { %12 = vsyncpa [#allocation3], 0  ;;  %s578_s0 = inlined_call_operand.hbm [shape: f32[16,32], index: 0, kind: input, shape index: {}]   ;;  %s579_s1 = inlined_call_operand.hbm [shape: bf16[32,32], index: 1, kind: input, shape index: {}]   ;;  %s580_s2 = inlined_call_operand.vmem [shape: f32[1,32], index: 2, kind: input, shape index: {}]   ;;  %s581_s3 = inlined_call_operand.hbm [shape: bf16[1,32,32], index: 3, kind: input, shape index: {}]   ;;  %s582_s4 = inlined_call_operand.vmem [shape: f32[1,1,32], index: 4, kind: input, shape index: {}]   ;;  %s583_s5 = inlined_call_operand.hbm [shape: bf16[32,128], index: 5, kind: input, shape index: {}]   ;;  %s584_s6 = inlined_call_operand.vmem [shape: f32[1,128], index: 6, kind: input, shape index: {}]   ;;  %s585_s7 = inlined_call_operand.hbm [shape: f32[16,128], index: 7, kind: output, shape index: {}]  }
   0x1   :  { %13 = vsyncpa [#allocation6], 0 }
   0x2   :  { %14 = vsyncpa [#allocation9], 0 }
   0x3   :  { %15 = vsyncpa [#allocation4], 0  ;;  %s485_s24 = smov [#allocation5]  }
   0x4   :  { %s33_s25 = sshll.u32 %s485_s24, 4  ;;  %s34_s25 = int_to_ptr.vmem [resolvable:$true] %s33_s25 }
   0x5   :  { %s385_s26 = scalar_lea.vmem %s34_s25, 256  ;;  %p390_p1 = scmp.lt.s32.totalorder %s34_s25, %s34_s25 }
   0x6   :  { %p386_p0 = scmp.ne.s32.totalorder %s34_s25, %s385_s26  ;;  %p391_p2 = scmp.lt.s32.totalorder %s385_s26, %s385_s26 }
   0x8   :  { %p392_p3 = por %p391_p2, %p390_p1 }
   0xa   :  { %p393_p4 = pnand %p392_p3, %p386_p0 }
   0xc   :  { %396 = shalt.err (!%p393_p4)
}
   0xd   :  { %s486_s27 = smov 64   ;;  %s487_s28 = smov 4  }
   0xe   :  { %39 = dma.hbm_to_vmem [thread:$0]  %s579_s1, 256, %s34_s25, [#allocation6], %s486_s27, %s486_s27, %s487_s28  }
   0xf   :  { %s488_s8 = smov [#allocation2]  }
  0x10   :  { %s21_s9 = sshll.u32 %s488_s8, 4  ;;  %s22_s9 = int_to_ptr.vmem [resolvable:$true] %s21_s9 }
  0x11   :  { %s405_s10 = scalar_lea.vmem %s22_s9, 256  ;;  %p410_p6 = scmp.lt.s32.totalorder %s22_s9, %s22_s9 }
  0x12   :  { %p406_p5 = scmp.ne.s32.totalorder %s22_s9, %s405_s10  ;;  %p411_p7 = scmp.lt.s32.totalorder %s405_s10, %s405_s10 }
  0x14   :  { %p412_p8 = por %p411_p7, %p410_p6 }
  0x16   :  { %p413_p9 = pnand %p412_p8, %p406_p5 }
  0x18   :  { %416 = shalt.err (!%p413_p9)
}
  0x19   :  { %s489_s11 = smov 128   ;;  %s490_s12 = smov 8  }
  0x1a   :  { %27 = dma.hbm_to_vmem [thread:$0]  %s578_s0, 256, %s22_s9, [#allocation3], %s489_s11, %s489_s11, %s490_s12  }
  0x1b   :  { %s491_s1 = smov [#allocation7]   ;;  %s492_s16 = smov [#allocation8]  }
  0x1c   :  { %s47_s15 = sshll.u32 %s491_s1, 4  ;;  %s61_s17 = sshll.u32 %s492_s16, 4  ;;  %s48_s15 = int_to_ptr.vmem [resolvable:$true] %s47_s15  ;;  %s62_s17 = int_to_ptr.vmem [resolvable:$true] %s61_s17 }
  0x1d   :  { %s425_s18 = scalar_lea.vmem %s48_s15, 256  ;;  %p430_p11 = scmp.lt.s32.totalorder %s48_s15, %s48_s15 }
  0x1e   :  { %p426_p10 = scmp.ne.s32.totalorder %s48_s15, %s425_s18  ;;  %p431_p12 = scmp.lt.s32.totalorder %s425_s18, %s425_s18 }
  0x20   :  { %p432_p13 = por %p431_p12, %p430_p11 }
  0x22   :  { %p433_p0 = pnand %p432_p13, %p426_p10 }
  0x24   :  { %436 = shalt.err (!%p433_p0)
}
  0x25   :  { %53 = dma.hbm_to_vmem [thread:$0]  %s581_s3, 256, %s48_s15, [#allocation6], %s486_s27, %s486_s27, %s487_s28  }
  0x26   :  { %s445_s0 = scalar_lea.vmem %s62_s17, 256  ;;  %p450_p2 = scmp.lt.s32.totalorder %s62_s17, %s62_s17 }
  0x27   :  { %p446_p1 = scmp.ne.s32.totalorder %s62_s17, %s445_s0  ;;  %p451_p3 = scmp.lt.s32.totalorder %s445_s0, %s445_s0 }
  0x29   :  { %p452_p4 = por %p451_p3, %p450_p2 }
  0x2b   :  { %p453_p5 = pnand %p452_p4, %p446_p1 }
  0x2d   :  { %456 = shalt.err (!%p453_p5)
}
  0x2e   :  { %67 = dma.hbm_to_vmem [thread:$0]  %s583_s5, 256, %s62_s17, [#allocation9], %s486_s27, %s486_s27, %s487_s28  }
  0x2f   :  { %477 = dma.done.wait [#allocation3], 256  }
  0x30   :  { %478 = vsyncadd [#allocation3], 4294967040 }
  0x31   :  { %479 = dma.done.wait [#allocation6], 512  }
  0x32   :  { %480 = vsyncadd [#allocation6], 4294966784 }
  0x33   :  { %481 = dma.done.wait [#allocation9], 256  }
  0x34   :  { %482 = vsyncadd [#allocation9], 4294967040  ;;  %v493_v0 = vmov 0.0   ;;  %vm494_vm0 = vmmov 0   ;;  %v371_v1 = vld [vmem:[#allocation5 + $0x8] sm:$0xff]   ;;  %v372_v2 = vld [vmem:[#allocation5] sm:$0xff]  }
  0x35   :  { %336 = vmatprep.subr.bf16.mxu0 %v493_v0  ;;  %340 = vmatprep.mubr.msk.bf16.mxu0 %vm494_vm0, %v493_v0  ;;  %v83_v3 = vld [vmem:[#allocation2] sm:$0xff]  ;;  %v84_v4 = vld [vmem:[#allocation2 + $0x8] sm:$0xff]  ;;  %vm109_vm1 = vcmask 261120   ;;  %v375_v18 = vld [vmem:[#allocation8 + $0x8] sm:$0xff]   ;;  %s495_s26 = smov [#allocation10]  }
  0x36   :  { %344 = vmatprep.subr.bf16.mxu1 %v493_v0  ;;  %348 = vmatprep.mubr.msk.bf16.mxu1 %vm494_vm0, %v493_v0  ;;  %v85_v5 = vpack.c.bf16 %v84_v4, %v83_v3  ;;  %v373_v6 = vld [vmem:[#allocation7 + $0x8] sm:$0xff]   ;;  %v374_v7 = vld [vmem:[#allocation7] sm:$0xff]   ;;  %v376_v19 = vld [vmem:[#allocation8] sm:$0xff]  }
  0x37   :  { %337 = vmatpush3.bf16.msra.mxu0 %v371_v1  ;;  %345 = vmatpush3.bf16.msra.mxu1 %v373_v6  ;;  %v315_v8 = vld [vmem:[%s580_s2] ss:$0 sm:$0xff] }
  0x38   :  { %338 = vmatprep.subr.bf16.mxu0 %v493_v0  ;;  %346 = vmatprep.subr.bf16.mxu1 %v493_v0  ;;  %v319_v20 = vld [vmem:[%s582_s4] ss:$0 sm:$0xff]  ;;  %s301_s4 = sshll.u32 %s495_s26, 4  ;;  %s302_s4 = int_to_ptr.vmem [resolvable:$true] %s301_s4 }
  0x39   :  { %v323_v30 = vld [vmem:[%s584_s6] ss:$0 sm:$0xff]  ;;  %s457_s27 = scalar_lea.vmem %s302_s4, 256  ;;  %p462_p7 = scmp.lt.s32.totalorder %s302_s4, %s302_s4 }
  0x3a   :  { %p458_p6 = scmp.ne.s32.totalorder %s302_s4, %s457_s27  ;;  %p463_p8 = scmp.lt.s32.totalorder %s457_s27, %s457_s27 }
  0x3b   :  { %339 = vmatpush3.bf16.msra.mxu0 %v372_v2  ;;  %347 = vmatpush3.bf16.msra.mxu1 %v374_v7 }
  0x3c   :  { %352 = vmatprep.subr.bf16.mxu0 %v493_v0  ;;  %p464_p9 = por %p463_p8, %p462_p7 }
  0x3e   :  { %341 = vmatmul.mubr.msk.bf16.vlgmr.msra.gmra.mxu0 %vm109_vm1, %v85_v5  ;;  %p465_p10 = pnand %p464_p9, %p458_p6 }
  0x3f   :  { %356 = vmatprep.mubr.msk.bf16.mxu0 %vm494_vm0, %v493_v0  ;;  %353 = vmatpush3.bf16.msra.mxu0 %v375_v18 }
  0x40   :  { %354 = vmatprep.subr.bf16.mxu0 %v493_v0 }
  0x43   :  { %355 = vmatpush3.bf16.msra.mxu0 %v376_v19 }
  0xfe   :  { %v147_v9 = vpop.f32.mrf.mxu0 }
  0xff   :  { %v148_v11 = vadd.f32 %v315_v8, %v147_v9 }
 0x100   :  { %v342_v10 = vpop.f32.mrf.mxu0 }
 0x101   :  { %v154_v15 = vmax.f32 %v148_v11, 0.0 }
 0x102   :  { %v150_v12 = vpop.f32.mrf.mxu0 }
 0x103   :  { %v151_v13 = vadd.f32 %v315_v8, %v150_v12 }
 0x104   :  { %v343_v14 = vpop.f32.mrf.mxu0 }
 0x105   :  { %v155_v16 = vmax.f32 %v151_v13, 0.0 }
 0x107   :  { %v156_v17 = vpack.c.bf16 %v155_v16, %v154_v15 }
 0x109   :  { %349 = vmatmul.mubr.msk.bf16.vlgmr.msra.gmra.mxu1 %vm109_vm1, %v156_v17 }
 0x1c9   :  { %v217_v21 = vpop.f32.mrf.mxu1 }
 0x1ca   :  { %v218_v23 = vadd.f32 %v319_v20, %v217_v21 }
 0x1cb   :  { %v350_v22 = vpop.f32.mrf.mxu1 }
 0x1cc   :  { %v224_v27 = vmax.f32 %v218_v23, 0.0 }
 0x1cd   :  { %v220_v24 = vpop.f32.mrf.mxu1 }
 0x1ce   :  { %v221_v25 = vadd.f32 %v319_v20, %v220_v24 }
 0x1cf   :  { %v351_v26 = vpop.f32.mrf.mxu1 }
 0x1d0   :  { %v225_v28 = vmax.f32 %v221_v25, 0.0 }
 0x1d2   :  { %v226_v29 = vpack.c.bf16 %v225_v28, %v224_v27 }
 0x1d4   :  { %357 = vmatmul.mubr.msk.bf16.vlgmr.msra.gmra.mxu0 %vm109_vm1, %v226_v29 }
 0x294   :  { %v287_v31 = vpop.f32.mrf.mxu0 }
 0x295   :  { %v288_v32 = vadd.f32 %v323_v30, %v287_v31 }
 0x296   :  { %v358_v33 = vpop.f32.mrf.mxu0 }
 0x297   :  { %294 = vst [vmem:[#allocation10] sm:$0xff] %v288_v32 }
 0x298   :  { %v290_v34 = vpop.f32.mrf.mxu0 }
 0x299   :  { %v291_v35 = vadd.f32 %v323_v30, %v290_v34 }
 0x29a   :  { %v359_v36 = vpop.f32.mrf.mxu0 }
 0x29b   :  { %295 = vst [vmem:[#allocation10 + $0x8] sm:$0xff] %v291_v35 }
 0x29c   :  { %468 = shalt.err (!%p465_p10)
}
 0x29d   :  { %307 = dma.vmem_to_hbm [thread:$0]  %s302_s4, 256, %s585_s7, [#allocation4], %s489_s11, %s489_s11, %s490_s12  }
 0x29e   :  { %483 = dma.done.wait [#allocation4], 256  }
 0x29f   :  { %484 = vsyncadd [#allocation4], 4294967040 }
 0x2a0   :  { %311 = vsyncpa [#allocation3], 1 }
 0x2a1   :  { %312 = vsyncpa [#allocation6], 1 }
 0x2a2   :  { %313 = vsyncpa [#allocation9], 1 }
 0x2a3   :  { %314 = vsyncpa [#allocation4], 1 }

</bundles_post_ra>
